<compile_context>
chip_gen: v7x
topology: tpu7x:2x2x1
jax: 0.10.0
libtpu: 0.0.40
codegen_flags: <defaults>
</compile_context>

<pallas_src>
import numpy as np
import jax
import jax.numpy as jnp
from jax.experimental import pallas as pl
from jax.experimental.pallas import tpu as pltpu


POOL_SIZES = (1, 2, 3, 6)
_SS_TOTAL = sum(s * s for s in POOL_SIZES)   # 1 + 4 + 9 + 36 = 50
_SS_PAD = 64                                 # stacked pooled axis padded to 64
_MAX_HW_TILE = 2048                          # target lanes per streamed HW tile


# ---------------------------------------------------------------------------
# Host-side operator construction (deterministic given sizes, cached)
# ---------------------------------------------------------------------------
def _adaptive_pool_matrix(out_size, in_size):
    """Row-stochastic matrix implementing torch AdaptiveAvgPool semantics (1-D)."""
    m = np.zeros((out_size, in_size), dtype=np.float32)
    for i in range(out_size):
        start = (i * in_size) // out_size                # floor(i*H/s)
        end = -((-(i + 1) * in_size) // out_size)        # ceil((i+1)*H/s)
        m[i, start:end] = 1.0 / (end - start)
    return m


def _bilinear_upsample_matrix(out_size, in_size):
    """Matrix implementing F.upsample(mode='bilinear', align_corners=True) in 1-D."""
    m = np.zeros((out_size, in_size), dtype=np.float32)
    if in_size == 1:
        m[:, 0] = 1.0
        return m
    for i in range(out_size):
        coord = i * (in_size - 1) / (out_size - 1)
        lo = int(np.floor(coord))
        hi = min(lo + 1, in_size - 1)
        frac = coord - lo
        m[i, lo] += 1.0 - frac
        m[i, hi] += frac
    return m


_OP_CACHE = {}


def _get_operators(H, W, cout):
    """Stacked pool / upsample operators + block-diagonal branch mask (cached)."""
    key = (H, W, cout)
    if key not in _OP_CACHE:
        HW = H * W
        pt_all = np.zeros((HW, _SS_PAD), np.float32)      # x(C,HW) @ pt -> pooled(C,SS)
        u_all = np.zeros((_SS_PAD, HW), np.float32)       # y(CO4,SS) @ u -> feats(CO4,HW)
        mask = np.zeros((4 * cout, _SS_PAD), np.float32)  # block-diagonal branch mask
        off = 0
        for k, s in enumerate(POOL_SIZES):
            ph = _adaptive_pool_matrix(s, H)
            pw = _adaptive_pool_matrix(s, W)
            uh = _bilinear_upsample_matrix(H, s)
            uw = _bilinear_upsample_matrix(W, s)
            p = np.kron(ph, pw)                           # (s*s, HW)
            u = np.kron(uh, uw)                           # (HW, s*s)
            n = s * s
            pt_all[:, off:off + n] = p.T
            u_all[off:off + n, :] = u.T
            mask[k * cout:(k + 1) * cout, off:off + n] = 1.0
            off += n
        assert off == _SS_TOTAL
        _OP_CACHE[key] = (jnp.asarray(pt_all, jnp.bfloat16),
                          jnp.asarray(u_all, jnp.bfloat16),
                          jnp.asarray(mask, jnp.float32))
    return _OP_CACHE[key]


def _fold_params(params, eps=1e-5):
    """Fold eval-mode BN into the 1x1 conv weights; stack the four branches."""
    w_blocks, b_blocks = [], []
    for p in params:
        scale = p['gamma'] / jnp.sqrt(p['var'] + eps)
        bias = p['beta'] - p['mean'] * scale
        w_blocks.append(p['w'] * scale[:, None])          # (Cout, C), BN scale folded
        b_blocks.append(bias)
    # Conv runs in f32 on the tiny (4*Cout, 64) pooled tile (once per batch element),
    # avoiding the pooled f32->bf16 double rounding flagged in the review.
    w_stack = jnp.concatenate(w_blocks, axis=0).astype(jnp.float32)    # (4*Cout, C)
    b_stack = jnp.concatenate(b_blocks, axis=0)[:, None].astype(jnp.float32)
    return w_stack, b_stack


# ---------------------------------------------------------------------------
# Tiling / VMEM-budget helpers
# ---------------------------------------------------------------------------
def _choose_hw_tile(HW, max_tile=_MAX_HW_TILE):
    """Largest 128-multiple divisor of HW up to max_tile (full HW if it fits)."""
    if HW <= max_tile:
        return HW
    t = (max_tile // 128) * 128
    while t >= 128:
        if HW % t == 0:
            return t
        t -= 128
    return HW  # ragged HW: fall back to one full block (see TODO above)


def _ceil_to(x, m):
    return -(-x // m) * m


def _padded_bytes(shape, itemsize):
    """Bytes of one VMEM-resident block after (8, 128) tiling padding."""
    dims = list(shape)
    dims[-1] = _ceil_to(dims[-1], 128)
    if len(dims) >= 2:
        dims[-2] = _ceil_to(dims[-2], 8)
    n = 1
    for d in dims:
        n *= d
    return n * itemsize


def _vmem_limit(block_bytes):
    """Derive a scoped VMEM limit from the actual block bytes, with headroom."""
    limit = int(1.5 * block_bytes) + (4 << 20)
    try:
        cap = int(pltpu.get_tpu_info().vmem_capacity_bytes * 3 // 4)
    except Exception:  # pragma: no cover - conservative fallback
        cap = 48 << 20
    cap = max(cap, 16 << 20)
    return min(max(limit, 16 << 20), cap)


# ---------------------------------------------------------------------------
# Kernel 1: streamed adaptive pooling (HW reduction) + conv + BN bias + ReLU
# ---------------------------------------------------------------------------
def _pool_conv_kernel(x_ref, pt_ref, w_ref, bias_ref, mask_ref, y_ref, pooled_acc):
    # x_ref:      (C, hw_tile)     f32  one streamed spatial tile of one batch elem
    # pt_ref:     (hw_tile, 64)    bf16 stacked adaptive-avg-pool operators (tile rows)
    # w_ref:      (4*Cout, C)      f32  stacked 1x1 conv weights (BN scale folded in)
    # bias_ref:   (4*Cout, 1)      f32  folded BN bias
    # mask_ref:   (4*Cout, 64)     f32  block-diagonal branch mask
    # y_ref:      (4*Cout, 64)     bf16 output: conv(pool(x)) + bias, ReLU'd, masked
    # pooled_acc: (C, 64)          f32  VMEM scratch accumulator
    t = pl.program_id(1)

    @pl.when(t == 0)
    def _():
        pooled_acc[...] = jnp.zeros_like(pooled_acc)

    # Per-tile bf16 cast (keeps the bf16 temporary to a single streamed tile);
    # all four pyramid pools accumulate through one MXU matmul, f32 accumulation.
    pooled_acc[...] += jnp.dot(x_ref[...].astype(jnp.bfloat16), pt_ref[...],
                               preferred_element_type=jnp.float32)

    @pl.when(t == pl.num_programs(1) - 1)
    def _():
        # All four 1x1 convs in one small f32 matmul on the pooled (C, 64) tile.
        z = jnp.dot(w_ref[...], pooled_acc[...],
                    preferred_element_type=jnp.float32) + bias_ref[...]
        # jnp.where (not multiply) so cross-branch non-finite terms cannot leak NaN.
        y = jnp.where(mask_ref[...] != 0.0, jnp.maximum(z, 0.0), 0.0)
        y_ref[...] = y.astype(y_ref.dtype)


# ---------------------------------------------------------------------------
# Kernel 2: streamed bilinear (align_corners=True) upsample of all four branches
# ---------------------------------------------------------------------------
def _upsample_kernel(y_ref, u_ref, o_ref):
    # y_ref: (4*Cout, 64)        bf16 masked branch activations
    # u_ref: (64, hw_tile)       bf16 stacked bilinear upsample operators (tile cols)
    # o_ref: (4*Cout, hw_tile)   branch features (lane-dense store)
    o_ref[...] = jnp.dot(y_ref[...], u_ref[...],
                         preferred_element_type=jnp.float32).astype(o_ref.dtype)


# ---------------------------------------------------------------------------
# Wrapper
# ---------------------------------------------------------------------------
def pyramid_pooling(x_nchw, params):
    """x_nchw: (B, C, H, W) -> (B, 2*C, H, W), matching the PyTorch module."""
    B, C, H, W = x_nchw.shape
    HW = H * W
    cout = params[0]['w'].shape[0]
    co4 = 4 * cout
    x_itemsize = np.dtype(x_nchw.dtype).itemsize

    pt_all, u_all, mask = _get_operators(H, W, cout)
    w_stack, b_stack = _fold_params(params)
    x_flat = x_nchw.reshape(B, C, HW)                  # free reshape (stays NCHW-major)

    hw_tile = _choose_hw_tile(HW)
    n_t = HW // hw_tile

    # ---- Call 1: pooling (HW reduction) + conv + BN bias + ReLU + branch mask ----
    blk1 = (2 * (_padded_bytes((C, hw_tile), 4)
                 + _padded_bytes((hw_tile, _SS_PAD), 2)
                 + _padded_bytes((co4, C), 4)
                 + _padded_bytes((co4, 1), 4)
                 + _padded_bytes((co4, _SS_PAD), 4)
                 + _padded_bytes((co4, _SS_PAD), 2))
            + _padded_bytes((C, _SS_PAD), 4))
    cost1 = pl.CostEstimate(
        flops=int(2 * B * C * HW * _SS_PAD + 2 * B * co4 * C * _SS_PAD),
        transcendentals=0,
        bytes_accessed=int(B * C * HW * x_itemsize + HW * _SS_PAD * 2
                           + co4 * C * 4 + co4 * 4 + co4 * _SS_PAD * 4
                           + B * co4 * _SS_PAD * 2))

    y = pl.pallas_call(
        _pool_conv_kernel,
        out_shape=jax.ShapeDtypeStruct((B, co4, _SS_PAD), jnp.bfloat16),
        grid=(B, n_t),
        in_specs=[
            pl.BlockSpec((None, C, hw_tile), lambda b, t: (b, 0, t)),   # x tile
            pl.BlockSpec((hw_tile, _SS_PAD), lambda b, t: (t, 0)),      # pool op tile
            pl.BlockSpec((co4, C), lambda b, t: (0, 0)),                # conv weights
            pl.BlockSpec((co4, 1), lambda b, t: (0, 0)),                # folded bias
            pl.BlockSpec((co4, _SS_PAD), lambda b, t: (0, 0)),          # branch mask
        ],
        out_specs=pl.BlockSpec((None, co4, _SS_PAD), lambda b, t: (b, 0, 0)),
        scratch_shapes=[pltpu.VMEM((C, _SS_PAD), jnp.float32)],
        compiler_params=pltpu.CompilerParams(
            dimension_semantics=("parallel", "arbitrary"),
            vmem_limit_bytes=_vmem_limit(blk1)),
        cost_estimate=cost1,
    )(x_flat, pt_all, w_stack, b_stack, mask)

    # ---- Call 2: bilinear upsample of all four branches (fully parallel grid) ----
    blk2 = 2 * (_padded_bytes((co4, _SS_PAD), 2)
                + _padded_bytes((_SS_PAD, hw_tile), 2)
                + _padded_bytes((co4, hw_tile), x_itemsize))
    cost2 = pl.CostEstimate(
        flops=int(2 * B * co4 * _SS_PAD * HW),
        transcendentals=0,
        bytes_accessed=int(B * co4 * _SS_PAD * 2 + _SS_PAD * HW * 2
                           + B * co4 * HW * x_itemsize))

    feats = pl.pallas_call(
        _upsample_kernel,
        out_shape=jax.ShapeDtypeStruct((B, co4, HW), x_nchw.dtype),
        grid=(B, n_t),
        in_specs=[
            pl.BlockSpec((None, co4, _SS_PAD), lambda b, t: (b, 0, 0)),
            pl.BlockSpec((_SS_PAD, hw_tile), lambda b, t: (0, t)),
        ],
        out_specs=pl.BlockSpec((None, co4, hw_tile), lambda b, t: (b, 0, t)),
        compiler_params=pltpu.CompilerParams(
            dimension_semantics=("parallel", "parallel"),
            vmem_limit_bytes=_vmem_limit(blk2)),
        cost_estimate=cost2,
    )(y, u_all)

    feats = feats.reshape(B, co4, H, W)
    # Identity passthrough of x stays out of the kernel (VMEM / vst budget): the
    # torch.cat((x, feat1..4), 1) is a plain XLA concatenate (memcpy).
    return jnp.concatenate((x_nchw, feats), axis=1)


# ---------------------------------------------------------------------------
# Parameters + pure-JAX reference (f32) for correctness checking
# ---------------------------------------------------------------------------
def init_params(key, in_channels):
    """Deterministic synthetic per-branch params (conv weight + eval-mode BN stats)."""
    out_channels = in_channels // 4
    params = []
    for _ in range(4):
        k1, k2, k3, k4, k5, key = jax.random.split(key, 6)
        params.append(dict(
            w=0.1 * jax.random.normal(k1, (out_channels, in_channels), jnp.float32),
            gamma=1.0 + 0.1 * jax.random.normal(k2, (out_channels,), jnp.float32),
            beta=0.1 * jax.random.normal(k3, (out_channels,), jnp.float32),
            mean=0.1 * jax.random.normal(k4, (out_channels,), jnp.float32),
            var=jnp.abs(jax.random.normal(k5, (out_channels,), jnp.float32)) + 0.5,
        ))
    return params


def reference(x_nchw, params, eps=1e-5):
    """Pure-JAX f32 reference of the same forward (pool -> conv -> BN -> ReLU -> up)."""
    B, C, H, W = x_nchw.shape
    feats = [x_nchw]
    for s, p in zip(POOL_SIZES, params):
        ph = jnp.asarray(_adaptive_pool_matrix(s, H))
        pw = jnp.asarray(_adaptive_pool_matrix(s, W))
        uh = jnp.asarray(_bilinear_upsample_matrix(H, s))
        uw = jnp.asarray(_bilinear_upsample_matrix(W, s))
        pooled = jnp.einsum('sh,bchw,tw->bcst', ph, x_nchw, pw)
        y = jnp.einsum('oc,bcst->bost', p['w'], pooled)
        scale = p['gamma'] / jnp.sqrt(p['var'] + eps)
        bias = p['beta'] - p['mean'] * scale
        y = jnp.maximum(y * scale[None, :, None, None] + bias[None, :, None, None], 0.0)
        feats.append(jnp.einsum('hs,bost,wt->bohw', uh, y, uw))
    return jnp.concatenate(feats, axis=1)


if __name__ == "__main__":
    key = jax.random.PRNGKey(0)
    kx, kp = jax.random.split(key)
    B, C, H, W = 2, 16, 16, 16
    x = jax.random.normal(kx, (B, C, H, W), jnp.float32)
    params = init_params(kp, C)

    out = jax.block_until_ready(pyramid_pooling(x, params))
    ref = jax.block_until_ready(reference(x, params))

    assert out.shape == (B, 2 * C, H, W), out.shape
    max_err = float(jnp.max(jnp.abs(out - ref)))
    # bf16 pool/upsample matmul operands (f32 accumulation, f32 conv) vs f32 reference.
    assert jnp.allclose(out, ref, atol=2e-2, rtol=2e-2), max_err
    print("KERNEL_OK")
</pallas_src>

<mosaic_0001>
module attributes {stable_mosaic.version = 11 : i64} {
  func.func @_pool_conv_kernel(%arg0: i32, %arg1: i32, %arg2: memref<1x16x256xf32, #tpu.memory_space<vmem>>, %arg3: memref<256x64xbf16, #tpu.memory_space<vmem>>, %arg4: memref<16x16xf32, #tpu.memory_space<vmem>>, %arg5: memref<16x1xf32, #tpu.memory_space<vmem>>, %arg6: memref<16x64xf32, #tpu.memory_space<vmem>>, %arg7: memref<1x16x64xbf16, #tpu.memory_space<vmem>>, %arg8: memref<16x64xf32, #tpu.memory_space<vmem>>) attributes {dimension_semantics = [#tpu.dimension_semantics<parallel>, #tpu.dimension_semantics<arbitrary>], iteration_bounds = array<i64: 2, 1>, scalar_prefetch = 0 : i64, scratch_operands = 1 : i64, tpu.core_type = #tpu.core_type<tc>, window_params = [{transform_indices = @transform_0, window_bounds = array<i64: 1, 16, 256>}, {transform_indices = @transform_1, window_bounds = array<i64: 256, 64>}, {pipeline_mode = #tpu.pipeline_mode<synchronous>, transform_indices = @transform_2, window_bounds = array<i64: 16, 16>}, {pipeline_mode = #tpu.pipeline_mode<synchronous>, transform_indices = @transform_3, window_bounds = array<i64: 16, 1>}, {pipeline_mode = #tpu.pipeline_mode<synchronous>, transform_indices = @transform_4, window_bounds = array<i64: 16, 64>}, {transform_indices = @transform_5, window_bounds = array<i64: 1, 16, 64>}]} {
    %c0_i32 = arith.constant 0 : i32
    %0 = arith.cmpi eq, %arg1, %c0_i32 : i32
    %1 = arith.extui %0 : i1 to i32
    %c0_i32_0 = arith.constant 0 : i32
    %2 = arith.cmpi ne, %1, %c0_i32_0 : i32
    scf.if %2 {
      %cst_11 = arith.constant 0.000000e+00 : f32
      %14 = vector.broadcast %cst_11 : f32 to vector<16x64xf32>
      %c0_12 = arith.constant 0 : index
      %c0_13 = arith.constant 0 : index
      %15 = vector.load %arg8[%c0_12, %c0_13] : memref<16x64xf32, #tpu.memory_space<vmem>>, vector<16x64xf32>
      tpu.vector_store %arg8[%c0_12, %c0_13], %14 {strides = array<i32>} : memref<16x64xf32, #tpu.memory_space<vmem>>, vector<16x64xf32>,
    } else {
    }
    %c0 = arith.constant 0 : index
    %c0_1 = arith.constant 0 : index
    %3 = vector.load %arg8[%c0, %c0_1] : memref<16x64xf32, #tpu.memory_space<vmem>>, vector<16x64xf32>
    %c0_2 = arith.constant 0 : index
    %c0_3 = arith.constant 0 : index
    %c0_4 = arith.constant 0 : index
    %4 = vector.load %arg2[%c0_2, %c0_3, %c0_4] : memref<1x16x256xf32, #tpu.memory_space<vmem>>, vector<1x16x256xf32>
    %5 = vector.shape_cast %4 : vector<1x16x256xf32> to vector<16x256xf32>
    %6 = arith.truncf %5 : vector<16x256xf32> to vector<16x256xbf16>
    %c0_5 = arith.constant 0 : index
    %c0_6 = arith.constant 0 : index
    %7 = vector.load %arg3[%c0_5, %c0_6] : memref<256x64xbf16, #tpu.memory_space<vmem>>, vector<256x64xbf16>
    %cst = arith.constant dense<0.000000e+00> : vector<16x64xf32>
    %8 = tpu.matmul %6, %7, %cst {dimension_numbers = #tpu.dot_dimension_numbers<[1], [0], [0], [1], [0, 0, 1, 1], [], []>} : vector<16x256xbf16>, vector<256x64xbf16>, vector<16x64xf32> -> vector<16x64xf32>
    %9 = arith.addf %3, %8 : vector<16x64xf32>
    %c0_7 = arith.constant 0 : index
    %c0_8 = arith.constant 0 : index
    %10 = vector.load %arg8[%c0_7, %c0_8] : memref<16x64xf32, #tpu.memory_space<vmem>>, vector<16x64xf32>
    tpu.vector_store %arg8[%c0_7, %c0_8], %9 {strides = array<i32>} : memref<16x64xf32, #tpu.memory_space<vmem>>, vector<16x64xf32>,
    %c0_i32_9 = arith.constant 0 : i32
    %11 = arith.cmpi eq, %arg1, %c0_i32_9 : i32
    %12 = arith.extui %11 : i1 to i32
    %c0_i32_10 = arith.constant 0 : i32
    %13 = arith.cmpi ne, %12, %c0_i32_10 : i32
    scf.if %13 {
      %c0_11 = arith.constant 0 : index
      %c0_12 = arith.constant 0 : index
      %14 = vector.load %arg4[%c0_11, %c0_12] : memref<16x16xf32, #tpu.memory_space<vmem>>, vector<16x16xf32>
      %c0_13 = arith.constant 0 : index
      %c0_14 = arith.constant 0 : index
      %15 = vector.load %arg8[%c0_13, %c0_14] : memref<16x64xf32, #tpu.memory_space<vmem>>, vector<16x64xf32>
      %cst_15 = arith.constant dense<0.000000e+00> : vector<16x64xf32>
      %16 = tpu.matmul %14, %15, %cst_15 {dimension_numbers = #tpu.dot_dimension_numbers<[1], [0], [0], [1], [0, 0, 1, 1], [], []>} : vector<16x16xf32>, vector<16x64xf32>, vector<16x64xf32> -> vector<16x64xf32>
      %c0_16 = arith.constant 0 : index
      %c0_17 = arith.constant 0 : index
      %17 = vector.load %arg5[%c0_16, %c0_17] : memref<16x1xf32, #tpu.memory_space<vmem>>, vector<16x1xf32>
      %18 = vector.broadcast %17 : vector<16x1xf32> to vector<16x64xf32>
      %19 = arith.addf %16, %18 : vector<16x64xf32>
      %c0_18 = arith.constant 0 : index
      %c0_19 = arith.constant 0 : index
      %20 = vector.load %arg6[%c0_18, %c0_19] : memref<16x64xf32, #tpu.memory_space<vmem>>, vector<16x64xf32>
      %cst_20 = arith.constant 0.000000e+00 : f32
      %21 = vector.broadcast %cst_20 : f32 to vector<16x64xf32>
      %22 = arith.cmpf one, %20, %21 : vector<16x64xf32>
      %cst_21 = arith.constant 0.000000e+00 : f32
      %23 = vector.broadcast %cst_21 : f32 to vector<16x64xf32>
      %24 = arith.maximumf %19, %23 : vector<16x64xf32>
      %cst_22 = arith.constant 0.000000e+00 : f32
      %25 = vector.broadcast %cst_22 : f32 to vector<16x64xf32>
      %26 = arith.select %22, %24, %25 : vector<16x64xi1>, vector<16x64xf32>
      %27 = arith.truncf %26 : vector<16x64xf32> to vector<16x64xbf16>
      %c0_23 = arith.constant 0 : index
      %c0_24 = arith.constant 0 : index
      %c0_25 = arith.constant 0 : index
      %28 = vector.load %arg7[%c0_23, %c0_24, %c0_25] : memref<1x16x64xbf16, #tpu.memory_space<vmem>>, vector<1x16x64xbf16>
      %29 = vector.shape_cast %28 : vector<1x16x64xbf16> to vector<16x64xbf16>
      %30 = vector.shape_cast %27 : vector<16x64xbf16> to vector<1x16x64xbf16>
      tpu.vector_store %arg7[%c0_23, %c0_24, %c0_25], %30 {strides = array<i32>} : memref<1x16x64xbf16, #tpu.memory_space<vmem>>, vector<1x16x64xbf16>,
    } else {
    }
    return
  }
  func.func @transform_0(%arg0: i32, %arg1: i32) -> (i32, i32, i32) {
    %c0_i32 = arith.constant 0 : i32
    %c0_i32_0 = arith.constant 0 : i32
    return %arg0, %c0_i32, %arg1 : i32, i32, i32
  }
  func.func @transform_1(%arg0: i32, %arg1: i32) -> (i32, i32) {
    %c0_i32 = arith.constant 0 : i32
    %c0_i32_0 = arith.constant 0 : i32
    return %arg1, %c0_i32 : i32, i32
  }
  func.func @transform_2(%arg0: i32, %arg1: i32) -> (i32, i32) {
    %c0_i32 = arith.constant 0 : i32
    %c0_i32_0 = arith.constant 0 : i32
    %c0_i32_1 = arith.constant 0 : i32
    return %c0_i32, %c0_i32_0 : i32, i32
  }
  func.func @transform_3(%arg0: i32, %arg1: i32) -> (i32, i32) {
    %c0_i32 = arith.constant 0 : i32
    %c0_i32_0 = arith.constant 0 : i32
    %c0_i32_1 = arith.constant 0 : i32
    return %c0_i32, %c0_i32_0 : i32, i32
  }
  func.func @transform_4(%arg0: i32, %arg1: i32) -> (i32, i32) {
    %c0_i32 = arith.constant 0 : i32
    %c0_i32_0 = arith.constant 0 : i32
    %c0_i32_1 = arith.constant 0 : i32
    return %c0_i32, %c0_i32_0 : i32, i32
  }
  func.func @transform_5(%arg0: i32, %arg1: i32) -> (i32, i32, i32) {
    %c0_i32 = arith.constant 0 : i32
    %c0_i32_0 = arith.constant 0 : i32
    %c0_i32_1 = arith.constant 0 : i32
    return %arg0, %c0_i32, %c0_i32_0 : i32, i32, i32
  }
}

</mosaic_0001>

<bundles_post_ra>
// kernel: tpu_custom_call.1
= control target key start
LH: loop header
LB: loop body
LE: loop exit
PB: predicated region body
PF: predicated region fallthrough
CT: control target
= control target key end

     0   :  { %10 = vsyncpa [#allocation4], 0  ;;  %s1141_s0 = inlined_call_operand.vmem [shape: f32[2,16,256], index: 0, kind: input, shape index: {}]   ;;  %s1142_s1 = inlined_call_operand.vmem [shape: bf16[256,64], index: 1, kind: input, shape index: {}]   ;;  %s1143_s2 = inlined_call_operand.vmem [shape: f32[16,16], index: 2, kind: input, shape index: {}]   ;;  %s1144_s3 = inlined_call_operand.vmem [shape: f32[16,1], index: 3, kind: input, shape index: {}]   ;;  %s1145_s4 = inlined_call_operand.vmem [shape: f32[16,64], index: 4, kind: input, shape index: {}]   ;;  %s1146_s5 = inlined_call_operand.hbm [shape: bf16[2,16,64], index: 5, kind: output, shape index: {}]  }
   0x1   :  { %12 = vsyncpa [#allocation4 + $0x1], 0  ;;  %s954_s18 = smov 0   ;;  %s956_s19 = smov 0  }
   0x2   :  { %s958_s20 = smov 0   ;;  %s960_s21 = smov 0  }
   0x3   :  { %s962_s22 = smov 0   ;;  %s964_s23 = smov 0  }
   0x4 LB: > { %s688_s24 = sadd.s32 4294967295, %s917_s23   ;;  %s689_s25 = sadd.s32 4294967294, %s917_s23   ;;  %s917_s23 = sphi %s964_s23, %s18_s23   ;;  %s913_s22 = sphi %s962_s22, %s1153_s22   ;;  %s909_s21 = sphi %s960_s21, %s1152_s21   ;;  %s905_s20 = sphi %s958_s20, %s1151_s20   ;;  %s901_s19 = sphi %s956_s19, %s1150_s19   ;;  %s897_s18 = sphi %s954_s18, %s1149_s18  }
   0x5   : > { %s30_s26 = sadd.s32 1, %s913_s22  ;;  %s154_s27 = sadd.s32 1, %s905_s20 }
   0x6   : > { %p32_p0 = scmp.ge.s32.totalorder %s30_s26, 2  ;;  %p164_p1 = scmp.ne.s32.totalorder %s905_s20, %s901_s19 }
   0x7   : > { %p165_p2 = scmp.eq.s32.totalorder %s688_s24, 1  ;;  %p170_p3 = scmp.ne.s32.totalorder %s901_s19, %s897_s18 }
   0x8   : > { %s1155_s26 = smov (%p32_p0, %s30_s26), 0  ;;  %p171_p5 = scmp.eq.s32.totalorder %s689_s25, 1 }
   0x9   : > { %p994_p4 = por %p165_p2, %p164_p1  ;;  %s151_s29 = ssub.s32 %s913_s22, %s1155_s26 }
   0xa   : > { %p693_p6 = scmp.ge.s32.totalorder %s917_s23, 1  ;;  %p152_p7 = scmp.eq.s32.totalorder %s151_s29, 0 }
   0xb   : > { %p1001_p8 = por %p171_p5, %p170_p3  ;;  %p220_p9 = scmp.lt.s32.totalorder %s917_s23, 3 }
   0xc   : > { %s1007_s6 = scalar_select %p152_p7, %s905_s20, %s154_s27  }
   0xd   : > { %p221_p10 = pnand %p693_p6, %p220_p9 }
   0xe   : > { %v823_v0 = vld [vmem:[%s1142_s1 + $0x40] sm:$0xff] (!%p221_p10)   ;;  %v825_v2 = vld [vmem:[%s1142_s1 + $0x48] sm:$0xff] (!%p221_p10)   ;;  %p258_p11 = scmp.lt.s32.totalorder (!%p221_p10), %s909_s21, 1  ;;  %v827_v4 = vld [vmem:[%s1142_s1 + $0x50] sm:$0xff] (!%p221_p10)   ;;  %vm278_vm0 = vcmask (!%p221_p10), 523264   ;;  %v919_v22 = vmov (!%p221_p10), 0.0  }
   0xf   : > { %224 = sbr.rel (%p221_p10) target bundleno = 515 (0x203), region = 40  ;;  %v824_v1 = vld [vmem:[%s1142_s1] sm:$0xff] (!%p221_p10)   ;;  %726 = vmatprep.subr.bf16.mxu0 (!%p221_p10), %v823_v0  ;;  %v826_v3 = vld [vmem:[%s1142_s1 + $0x8] sm:$0xff] (!%p221_p10)   ;;  %v828_v5 = vld [vmem:[%s1142_s1 + $0x10] sm:$0xff] (!%p221_p10)   ;;  %279 = vst.msk [vmem:[#allocation2] sm:$0xff] (!%p221_p10), %vm278_vm0, %v919_v22  ;;  %vm482_vm1 = vcmask (!%p221_p10), 130048  }
  0x10   : > { %727 = vmatpush3.bf16.msra.mxu0 (!%p221_p10), %v824_v1  ;;  %v829_v6 = vld [vmem:[%s1142_s1 + $0x58] sm:$0xff] (!%p221_p10)   ;;  %v831_v8 = vld [vmem:[%s1142_s1 + $0x60] sm:$0xff] (!%p221_p10)   ;;  %v833_v10 = vld [vmem:[%s1142_s1 + $0x68] sm:$0xff] (!%p221_p10)   ;;  %280 = vst.msk [vmem:[#allocation2 + $0x8] sm:$0xff] (!%p221_p10), %vm278_vm0, %v919_v22  ;;  %v920_v25 = vmov (!%p221_p10), 0   ;;  %s725_s13 = sshll.u32 (!%p221_p10), %s909_s21, 7 }
  0x11   : > { %728 = vmatprep.subr.bf16.mxu0 (!%p221_p10), %v825_v2  ;;  %v830_v7 = vld [vmem:[%s1142_s1 + $0x18] sm:$0xff] (!%p221_p10)   ;;  %v832_v9 = vld [vmem:[%s1142_s1 + $0x20] sm:$0xff] (!%p221_p10)   ;;  %v834_v14 = vld [vmem:[%s1142_s1 + $0x28] sm:$0xff] (!%p221_p10)   ;;  %822 = vset.pattern.permute.xlu0 (!%p221_p10), %v920_v25  ;;  %vm580_vm4 = vcmask (!%p221_p10), 519168   ;;  %s921_s27 = smov (!%p221_p10), [#allocation3]  }
  0x12   : > { %v835_v15 = vld [vmem:[%s1142_s1 + $0x70] sm:$0xff] (!%p221_p10)   ;;  %v837_v17 = vld [vmem:[%s1142_s1 + $0x78] sm:$0xff] (!%p221_p10)   ;;  %v466_v23 = vld [vmem:[%s1143_s2] sm:$0xff] (!%p221_p10)  ;;  %s843_s29 = sshll.u32 (!%p221_p10), %s921_s27, 4  ;;  %s844_s29 = int_to_ptr.vmem [resolvable:$false] %s843_s29 }
  0x13   : > { %v836_v16 = vld [vmem:[%s1142_s1 + $0x30] sm:$0xff] (!%p221_p10)   ;;  %v838_v18 = vld [vmem:[%s1142_s1 + $0x38] sm:$0xff] (!%p221_p10)   ;;  %756 = vmatprep.mubr.msk.f32.mxu1 (!%p221_p10), %vm482_vm1, %v466_v23  ;;  %v470_v24 = vld [vmem:[%s1144_s3] sm:$0xff] (!%p221_p10) }
  0x14   : > { %729 = vmatpush3.bf16.msra.mxu0 (!%p221_p10), %v826_v3  ;;  %474 = vperm.xlu0 (!%p221_p10), %822, %v470_v24   ;;  %v471_v26 = vld [vmem:[%s1144_s3 + $0x8] sm:$0xff] (!%p221_p10)  ;;  %v564_v45 = vld [vmem:[%s1145_s4] sm:$0xff] (!%p221_p10) }
  0x15   : > { %730 = vmatprep.subr.bf16.mxu0 (!%p221_p10), %v827_v4  ;;  %v467_v40 = vld [vmem:[%s1143_s2 + $0x8] sm:$0xff] (!%p221_p10)  ;;  %vm566_vm3 = vcmp.ne.f32.partialorder (!%p221_p10), %v564_v45, 0.0 }
  0x16   : > { %s259_s17 = scalar_select %p258_p11, %s909_s21, 1  ;;  %v281_v28 = vld [vmem:[#allocation2] sm:$0xff]  ;;  %v565_v42 = vld [vmem:[%s1145_s4 + $0x8] sm:$0xff] }
  0x17   : > { %v282_v32 = vld [vmem:[#allocation2 + $0x8] sm:$0xff]  ;;  %vm567_vm2 = vcmp.ne.f32.partialorder %v565_v42, 0.0 }
  0x18   : > { %s722_s7 = sshll.u32 %s259_s17, 5  ;;  %731 = vmatpush3.bf16.msra.mxu0 %v828_v5  ;;  %479 = vperm.xlu0 %822, %v471_v26  }
  0x19   : > { %732 = vmatprep.subr.bf16.mxu0 %v829_v6  ;;  %s265_s14 = scalar_lea.vmem %s1141_s0, %s722_s7  ;;  %s254_s7 = sand.u32 1, %s901_s19  }
  0x1a   : > { %v284_v11 = vld [vmem:[%s265_s14 + $0x8] sm:$0xff]  ;;  %v286_v12 = vld [vmem:[%s265_s14 + $0x18] sm:$0xff]  ;;  %v283_v19 = vld [vmem:[%s265_s14] sm:$0xff]  ;;  %s694_s8 = sshll.u32 %s254_s7, 3  ;;  %s1095_s21 = scalar_lea.sflag [#allocation4], %s254_s7 }
  0x1b   : > { %v288_v13 = vpack.c.bf16 %v286_v12, %v284_v11  ;;  %v285_v20 = vld [vmem:[%s265_s14 + $0x10] sm:$0xff]  ;;  %s256_s15 = scalar_lea.vmem [#allocation3], %s694_s8  ;;  %s1091_s14 = scalar_lea.hbm %s1146_s5, %s725_s13 }
  0x1c   : > { %733 = vmatpush3.bf16.msra.mxu0 %v830_v7  ;;  %v287_v21 = vpack.c.bf16 %v285_v20, %v283_v19  ;;  %s597_s16 = sshll.u32 %s256_s15, 4  ;;  %s845_s8 = scalar_lea.vmem %s844_s29, 256  ;;  %s1093_s16 = int_to_ptr.vmem [resolvable:$true] %s597_s16 }
  0x1d   : > { %734 = vmatprep.subr.bf16.mxu0 %v831_v8  ;;  %449 = vmatprep.mubr.bf16.mxu0 %v288_v13  ;;  %s839_s25 = scalar_lea.vmem %s1093_s16, 128  ;;  %p846_p1 = scmp.lt.s32.totalorder %s1093_s16, %s844_s29 }
  0x1e   : > { %p840_p12 = scmp.ne.s32.totalorder %s1093_s16, %s839_s25  ;;  %p847_p2 = scmp.lt.s32.totalorder %s845_s8, %s839_s25 }
  0x20   : > { %735 = vmatpush3.bf16.msra.mxu0 %v832_v9  ;;  %p841_p13 = pnand %p840_p12, %p994_p4  ;;  %p848_p3 = por %p847_p2, %p846_p1 }
  0x21   : > { %736 = vmatprep.subr.bf16.mxu0 %v833_v10 }
  0x22   : > { %p842_p0 = pneg %p841_p13 }
  0x24   : > { %737 = vmatpush3.bf16.msra.mxu0 %v834_v14  ;;  %p849_p5 = pnand %p848_p3, %p842_p0 }
  0x25   : > { %738 = vmatprep.subr.bf16.mxu0 %v835_v15 }
  0x28   : > { %739 = vmatpush3.bf16.msra.mxu0 %v836_v16 }
  0x29   : > { %740 = vmatprep.subr.bf16.mxu0 %v837_v17 }
  0x2c   : > { %741 = vmatpush3.bf16.msra.mxu0 %v838_v18 }
  0x2f   : > { %450 = vmatmul.mubr.bf16.vlgmr.msra.gmra.mrb[0].mxu0 %v287_v21 }
  0x93   : > { %v475_v41 = vpop.permute.xlu0 %474 }
  0x97   : > { %v480_v43 = vpop.permute.xlu0 %479 }
 0x102   : > { %v742_v27 = vpop.f32.mrb[0].mxu0 }
 0x103   : > { %v743_v29 = vpop.f32.mrb[1].mxu0 }
 0x104   : > { %v744_v30 = vadd.f32 %v743_v29, %v742_v27  ;;  %v745_v31 = vpop.f32.mrb[2].mxu0 }
 0x105   : > { %v746_v33 = vpop.f32.mrb[3].mxu0 }
 0x106   : > { %v458_v34 = vadd.f32 %v744_v30, %v281_v28  ;;  %v747_v35 = vadd.f32 %v746_v33, %v745_v31 }
 0x108   : > { %461 = vst.msk [vmem:[#allocation2] sm:$0xff] %vm278_vm0, %v458_v34  ;;  %v459_v36 = vadd.f32 %v747_v35, %v282_v32 }
 0x10a   : > { %462 = vst.msk [vmem:[#allocation2 + $0x8] sm:$0xff] %vm278_vm0, %v459_v36 }
 0x10f   : > { %v468_v37 = vld [vmem:[#allocation2] sm:$0xff] }
 0x111   : > { %v469_v38 = vld [vmem:[#allocation2 + $0x8] sm:$0xff] }
 0x112   : > { %v759_v39 = vpack.c.bf16 %v469_v38, %v468_v37 }
 0x114   : > { %760 = vmatprep.subr.bf16.mxu1 %v759_v39 }
 0x115   : > { %762 = vmatpush3.bf16.msra.mxu1 %v759_v39 }
 0x118   : > { %757 = vmatmul.mubr.msk.f32.vlgmr.msra.gmra.mrb[0].mxu1 %vm482_vm1, %v467_v40 }
 0x1eb   : > { %v758_v44 = vpop.f32.mrb[0].mxu1 }
 0x1ec   : > { %v561_v46 = vadd.f32 %v758_v44, %v480_v43  ;;  %v555_v47 = vpop.f32.mrb[1].mxu1 }
 0x1ed   : > { %v556_v48 = vadd.f32 %v555_v47, %v475_v41 }
 0x1ee   : > { %v569_v49 = vmax.f32 %v561_v46, 0.0 }
 0x1ef   : > { %v568_v50 = vmax.f32 %v556_v48, 0.0 }
 0x1f0   : > { %v571_v51 = vsel %vm567_vm2, %v569_v49, 0.0 }
 0x1f1   : > { %v724_v52 = vpack.c.bf16 %v571_v51, %v571_v51  ;;  %v570_v53 = vsel %vm566_vm3, %v568_v50, 0.0 }
 0x1f2   : > { %v723_v54 = vpack.c.bf16 %v570_v53, %v570_v53 }
 0x1f3   : > { %582 = vst.msk [vmem:[%s256_s15 + $0x4] sm:$0xf] %vm580_vm4, %v724_v52 }
 0x1f4   : > { %581 = vst.msk [vmem:[%s256_s15] sm:$0xf] %vm580_vm4, %v723_v54 }
 0x1f5   : > { %852 = shalt.err (!%p849_p5)
}
 0x1f6   : > { %s853_s7 = scalar_lea.hbm %s1091_s14, 128  ;;  %s857_s11 = scalar_lea.hbm %s1146_s5, 256 }
 0x1f7   : > { %p854_p6 = scmp.ne.s32.totalorder %s1091_s14, %s853_s7  ;;  %p858_p10 = scmp.lt.u32.totalorder %s1091_s14, %s1146_s5 }
 0x1f8   : > { %p859_p11 = scmp.lt.u32.totalorder %s857_s11, %s853_s7  ;;  %p861_p13 = scmp.lt.u32.totalorder %s853_s7, %s1091_s14 }
 0x1f9   : > { %p855_p7 = pnand %p854_p6, %p994_p4 }
 0x1fa   : > { %p860_p12 = por %p859_p11, %p858_p10 }
 0x1fb   : > { %p856_p9 = pneg %p855_p7 }
 0x1fc   : > { %p862_p0 = por %p861_p13, %p860_p12 }
 0x1fe   : > { %p863_p1 = pnand %p862_p0, %p856_p9 }
 0x200   : > { %866 = shalt.err (!%p863_p1)
}
 0x201   : > { %s922_s15 = smov 64   ;;  %s923_s17 = smov 4  }
 0x202   : > { %763 = dma.vmem_to_hbm [thread:$0]  (%p994_p4), %s1093_s16, 128, %s1091_s14, %s1095_s21, %s922_s15, %s922_s15, %s923_s17  }
 0x203 PF: > { %p769_p2 = scmp.ge.s32.totalorder %s917_s23, 2  ;;  %s612_s24 = sand.u32 1, %s897_s18  }
 0x204   : > { %s613_s25 = scalar_lea.sflag [#allocation4], %s612_s24 }
 0x205   : > { %p766_p3 = pnand %p769_p2, %p1001_p8 }
 0x207   : > { %892 = dma.done.wait (!%p766_p3), %s613_s25, 128  }
 0x208   : > { %894 = vsyncadd (!%p766_p3), %s613_s25, 4294967168  ;;  %s18_s23 = sadd.s32 1, %s917_s23   ;;  %s1149_s18 = smov %s901_s19 }
 0x209   : > { %p15_p5 = scmp.ge.s32.totalorder %s18_s23, 4   ;;  %s1150_s19 = smov %s905_s20 }
 0x20a   : > { %s1151_s20 = smov %s1007_s6  ;;  %s1152_s21 = smov %s913_s22 }
 0x20b   : > { %s1153_s22 = smov %s1155_s26  ;;  %17 = sbr.rel (!%p15_p5) target bundleno = 4 (0x4), region = 86 }
 0x212   :  { %618 = vsyncpa [#allocation4], 1 }
 0x213   :  { %620 = vsyncpa [#allocation4 + $0x1], 1 }

</bundles_post_ra>
